<compile_context>
chip_gen: v7x
topology: tpu7x:2x2x1
jax: 0.10.0
libtpu: 0.0.40
codegen_flags: <defaults>
</compile_context>

<pallas_src>
import functools

import jax
import jax.numpy as jnp
from jax.experimental import pallas as pl
from jax.experimental.pallas import tpu as pltpu


def _round_up(n, m):
    return ((n + m - 1) // m) * m


def _cdiv(a, b):
    return -(-a // b)


def _simplenet_kernel(x_ref, w1_ref, b1_ref, w2_ref, b2_ref, out_ref):
    # x_ref:  (TB, F)  f32        w1_ref: (F, H)  compute dtype
    # b1_ref: (1, H)   f32        w2_ref: (H, C)  compute dtype
    # b2_ref: (1, C)   f32        out_ref: (TB, C) f32
    x = x_ref[...].astype(w1_ref.dtype)            # cast in-kernel (no extra HBM pass)
    # fc1 (MXU, f32 accumulation) + bias + ReLU; epilogue in f32 (v5e-safe).
    h = jnp.dot(x, w1_ref[...], preferred_element_type=jnp.float32)
    h = jnp.maximum(h + b1_ref[...], 0.0)
    # fc2, fed in the weight compute dtype (no-op when f32).
    h = h.astype(w2_ref.dtype)
    y = jnp.dot(h, w2_ref[...], preferred_element_type=jnp.float32) + b2_ref[...]
    out_ref[...] = y.astype(out_ref.dtype)


def prepare_params(w1, b1, w2, b2, compute_dtype=jnp.bfloat16):
    """One-time conversion from PyTorch nn.Linear layout to kernel layout.

    w1: (hidden, num_features), b1: (hidden,)
    w2: (num_classes, hidden),  b2: (num_classes,)
    Weights are pre-transposed to (in, out); no lane padding (the kernel uses
    full-extent blocks for F/H/C). All returned leaves are jax arrays so the
    dict is a valid jit argument.
    """
    H, F = w1.shape
    C = w2.shape[0]
    w1t = jnp.asarray(w1, compute_dtype).T.reshape(F, H)
    b1r = jnp.asarray(b1, jnp.float32).reshape(1, H)
    w2t = jnp.asarray(w2, compute_dtype).T.reshape(H, C)
    b2r = jnp.asarray(b2, jnp.float32).reshape(1, C)
    return dict(w1t=w1t, b1=b1r, w2t=w2t, b2=b2r)


@functools.partial(jax.jit, static_argnames=("tb",))
def simplenet_forward(x, params, tb=2048):
    """Forward pass: relu(x.view(-1, F) @ W1^T + b1) @ W2^T + b2 (SimpleNet.forward)."""
    w1t, b1, w2t, b2 = params["w1t"], params["b1"], params["w2t"], params["b2"]
    F, H = w1t.shape
    C = w2t.shape[1]

    xf = x.reshape(-1, F)                       # mirrors x.view(-1, num_features)
    B = xf.shape[0]

    # Balanced batch tiling: pad B only to a multiple of 16 (bf16 sublane pack),
    # then split into equal tiles no larger than `tb`.
    Bp = _round_up(B, 16)
    n_tiles = max(1, _cdiv(Bp, int(tb)))
    TB = _round_up(_cdiv(Bp, n_tiles), 16)
    Bp = n_tiles * TB

    if Bp != B:
        xp = jnp.zeros((Bp, F), xf.dtype).at[:B, :].set(xf)
    else:
        xp = xf

    flops = 2 * B * F * H + 2 * B * H * C
    bytes_accessed = (Bp * F * xp.dtype.itemsize
                      + w1t.size * w1t.dtype.itemsize
                      + w2t.size * w2t.dtype.itemsize
                      + b1.size * 4 + b2.size * 4
                      + Bp * C * 4)

    out = pl.pallas_call(
        _simplenet_kernel,
        out_shape=jax.ShapeDtypeStruct((Bp, C), jnp.float32),
        grid_spec=pl.GridSpec(
            grid=(n_tiles,),
            in_specs=[
                pl.BlockSpec((TB, F), lambda i: (i, 0)),   # activations: tiled over batch
                pl.BlockSpec((F, H), lambda i: (0, 0)),    # W1: VMEM-resident
                pl.BlockSpec((1, H), lambda i: (0, 0)),    # b1: resident
                pl.BlockSpec((H, C), lambda i: (0, 0)),    # W2: resident
                pl.BlockSpec((1, C), lambda i: (0, 0)),    # b2: resident
            ],
            out_specs=pl.BlockSpec((TB, C), lambda i: (i, 0)),
        ),
        compiler_params=pltpu.CompilerParams(
            dimension_semantics=("parallel",)),            # megacore sharding on v7x
        cost_estimate=pl.CostEstimate(
            flops=flops, transcendentals=0, bytes_accessed=bytes_accessed),
    )(xp, w1t, b1, w2t, b2)

    return out[:B] if Bp != B else out


def init_params_torch_layout(key, num_features, hidden_size, num_classes,
                             dtype=jnp.float32):
    """Deterministic PyTorch-style uniform init for the two Linear layers."""
    k1, k2, k3, k4 = jax.random.split(key, 4)
    bound1 = 1.0 / (num_features ** 0.5)
    bound2 = 1.0 / (hidden_size ** 0.5)
    w1 = jax.random.uniform(k1, (hidden_size, num_features), dtype, -bound1, bound1)
    b1 = jax.random.uniform(k2, (hidden_size,), dtype, -bound1, bound1)
    w2 = jax.random.uniform(k3, (num_classes, hidden_size), dtype, -bound2, bound2)
    b2 = jax.random.uniform(k4, (num_classes,), dtype, -bound2, bound2)
    return w1, b1, w2, b2


if __name__ == "__main__":
    num_features = 32
    hidden_size = 64
    num_classes = 16

    key = jax.random.PRNGKey(0)
    kx, kx2, kp = jax.random.split(key, 3)
    w1, b1, w2, b2 = init_params_torch_layout(kp, num_features, hidden_size, num_classes)

    def ref_fwd(xin):
        return jnp.maximum(xin.reshape(-1, num_features) @ w1.T + b1, 0.0) @ w2.T + b2

    # --- small-batch f32 check (single grid step, batch padded 8 -> 16) ---
    params_f32 = prepare_params(w1, b1, w2, b2, compute_dtype=jnp.float32)
    x_small = jax.random.normal(kx, (8, num_features), jnp.float32)
    out_small = jax.block_until_ready(simplenet_forward(x_small, params_f32))
    assert out_small.shape == (8, num_classes)
    assert jnp.allclose(out_small, ref_fwd(x_small), atol=1e-5, rtol=1e-5)

    # --- larger ragged batch exercising balanced batch tiling (grid > 1) ---
    x_big = jax.random.normal(kx2, (300, num_features), jnp.float32)
    out_big = jax.block_until_ready(simplenet_forward(x_big, params_f32, tb=160))
    assert out_big.shape == (300, num_classes)
    assert jnp.allclose(out_big, ref_fwd(x_big), atol=1e-5, rtol=1e-5)

    # --- default bf16 weight path (v5e/v6e/v7x fast path), f32 accumulation ---
    params_bf16 = prepare_params(w1, b1, w2, b2)   # compute_dtype=bfloat16 default
    out_bf16 = jax.block_until_ready(simplenet_forward(x_small, params_bf16))
    assert out_bf16.shape == (8, num_classes)
    assert jnp.allclose(out_bf16, ref_fwd(x_small), atol=5e-2, rtol=5e-2)

    print("KERNEL_OK")
</pallas_src>

<mosaic_0001>
module attributes {stable_mosaic.version = 11 : i64} {
  func.func @_simplenet_kernel(%arg0: i32, %arg1: memref<16x32xf32, #tpu.memory_space<vmem>>, %arg2: memref<32x64xf32, #tpu.memory_space<vmem>>, %arg3: memref<1x64xf32, #tpu.memory_space<vmem>>, %arg4: memref<64x16xf32, #tpu.memory_space<vmem>>, %arg5: memref<1x16xf32, #tpu.memory_space<vmem>>, %arg6: memref<16x16xf32, #tpu.memory_space<vmem>>) attributes {dimension_semantics = [#tpu.dimension_semantics<parallel>], iteration_bounds = array<i64: 1>, scalar_prefetch = 0 : i64, scratch_operands = 0 : i64, tpu.core_type = #tpu.core_type<tc>, window_params = [{transform_indices = @transform_0, window_bounds = array<i64: 16, 32>}, {pipeline_mode = #tpu.pipeline_mode<synchronous>, transform_indices = @transform_1, window_bounds = array<i64: 32, 64>}, {pipeline_mode = #tpu.pipeline_mode<synchronous>, transform_indices = @transform_2, window_bounds = array<i64: 1, 64>}, {pipeline_mode = #tpu.pipeline_mode<synchronous>, transform_indices = @transform_3, window_bounds = array<i64: 64, 16>}, {pipeline_mode = #tpu.pipeline_mode<synchronous>, transform_indices = @transform_4, window_bounds = array<i64: 1, 16>}, {transform_indices = @transform_5, window_bounds = array<i64: 16, 16>}]} {
    %c0 = arith.constant 0 : index
    %c0_0 = arith.constant 0 : index
    %0 = vector.load %arg1[%c0, %c0_0] : memref<16x32xf32, #tpu.memory_space<vmem>>, vector<16x32xf32>
    %c0_1 = arith.constant 0 : index
    %c0_2 = arith.constant 0 : index
    %1 = vector.load %arg2[%c0_1, %c0_2] : memref<32x64xf32, #tpu.memory_space<vmem>>, vector<32x64xf32>
    %cst = arith.constant dense<0.000000e+00> : vector<16x64xf32>
    %2 = tpu.matmul %0, %1, %cst {dimension_numbers = #tpu.dot_dimension_numbers<[1], [0], [0], [1], [0, 0, 1, 1], [], []>} : vector<16x32xf32>, vector<32x64xf32>, vector<16x64xf32> -> vector<16x64xf32>
    %c0_3 = arith.constant 0 : index
    %c0_4 = arith.constant 0 : index
    %3 = vector.load %arg3[%c0_3, %c0_4] : memref<1x64xf32, #tpu.memory_space<vmem>>, vector<1x64xf32>
    %4 = vector.broadcast %3 : vector<1x64xf32> to vector<16x64xf32>
    %5 = arith.addf %2, %4 : vector<16x64xf32>
    %cst_5 = arith.constant 0.000000e+00 : f32
    %6 = vector.broadcast %cst_5 : f32 to vector<16x64xf32>
    %7 = arith.maximumf %5, %6 : vector<16x64xf32>
    %c0_6 = arith.constant 0 : index
    %c0_7 = arith.constant 0 : index
    %8 = vector.load %arg4[%c0_6, %c0_7] : memref<64x16xf32, #tpu.memory_space<vmem>>, vector<64x16xf32>
    %cst_8 = arith.constant dense<0.000000e+00> : vector<16x16xf32>
    %9 = tpu.matmul %7, %8, %cst_8 {dimension_numbers = #tpu.dot_dimension_numbers<[1], [0], [0], [1], [0, 0, 1, 1], [], []>} : vector<16x64xf32>, vector<64x16xf32>, vector<16x16xf32> -> vector<16x16xf32>
    %c0_9 = arith.constant 0 : index
    %c0_10 = arith.constant 0 : index
    %10 = vector.load %arg5[%c0_9, %c0_10] : memref<1x16xf32, #tpu.memory_space<vmem>>, vector<1x16xf32>
    %11 = vector.broadcast %10 : vector<1x16xf32> to vector<16x16xf32>
    %12 = arith.addf %9, %11 : vector<16x16xf32>
    %c0_11 = arith.constant 0 : index
    %c0_12 = arith.constant 0 : index
    %13 = vector.load %arg6[%c0_11, %c0_12] : memref<16x16xf32, #tpu.memory_space<vmem>>, vector<16x16xf32>
    tpu.vector_store %arg6[%c0_11, %c0_12], %12 {strides = array<i32>} : memref<16x16xf32, #tpu.memory_space<vmem>>, vector<16x16xf32>,
    return
  }
  func.func @transform_0(%arg0: i32) -> (i32, i32) {
    %c0_i32 = arith.constant 0 : i32
    %c0_i32_0 = arith.constant 0 : i32
    return %arg0, %c0_i32 : i32, i32
  }
  func.func @transform_1(%arg0: i32) -> (i32, i32) {
    %c0_i32 = arith.constant 0 : i32
    %c0_i32_0 = arith.constant 0 : i32
    %c0_i32_1 = arith.constant 0 : i32
    return %c0_i32, %c0_i32_0 : i32, i32
  }
  func.func @transform_2(%arg0: i32) -> (i32, i32) {
    %c0_i32 = arith.constant 0 : i32
    %c0_i32_0 = arith.constant 0 : i32
    %c0_i32_1 = arith.constant 0 : i32
    return %c0_i32, %c0_i32_0 : i32, i32
  }
  func.func @transform_3(%arg0: i32) -> (i32, i32) {
    %c0_i32 = arith.constant 0 : i32
    %c0_i32_0 = arith.constant 0 : i32
    %c0_i32_1 = arith.constant 0 : i32
    return %c0_i32, %c0_i32_0 : i32, i32
  }
  func.func @transform_4(%arg0: i32) -> (i32, i32) {
    %c0_i32 = arith.constant 0 : i32
    %c0_i32_0 = arith.constant 0 : i32
    %c0_i32_1 = arith.constant 0 : i32
    return %c0_i32, %c0_i32_0 : i32, i32
  }
  func.func @transform_5(%arg0: i32) -> (i32, i32) {
    %c0_i32 = arith.constant 0 : i32
    %c0_i32_0 = arith.constant 0 : i32
    return %arg0, %c0_i32 : i32, i32
  }
}

</mosaic_0001>

<bundles_post_ra>
// kernel: simplenet_forward.1
= control target key start
LH: loop header
LB: loop body
LE: loop exit
PB: predicated region body
PF: predicated region fallthrough
CT: control target
= control target key end

     0   :  { %vm33_vm0 = vcmask 261120   ;;  %vm132_vm1 = vcmask 523264   ;;  %vm214_vm2 = vcmask 130048   ;;  %s383_s1 = inlined_call_operand.vmem [shape: f32[32,64], index: 1, kind: input, shape index: {}]   ;;  %s384_s0 = inlined_call_operand.vmem [shape: f32[16,32], index: 0, kind: input, shape index: {}]   ;;  %s385_s3 = inlined_call_operand.vmem [shape: f32[64,16], index: 3, kind: input, shape index: {}]   ;;  %s386_s2 = inlined_call_operand.vmem [shape: f32[1,64], index: 2, kind: input, shape index: {}]   ;;  %s387_s4 = inlined_call_operand.vmem [shape: f32[1,16], index: 4, kind: input, shape index: {}]   ;;  %s388_s5 = inlined_call_operand.vmem [shape: f32[16,16], index: 5, kind: output, shape index: {}]  }
   0x1   :  { %v22_v0 = vld [vmem:[%s383_s1] sm:$0xff]  ;;  %v23_v1 = vld [vmem:[%s383_s1 + $0x8] sm:$0xff]  ;;  %v24_v2 = vld [vmem:[%s383_s1 + $0x10] sm:$0xff] }
   0x2   :  { %v273_v3 = vpack.c.bf16 %v23_v1, %v22_v0  ;;  %v25_v4 = vld [vmem:[%s383_s1 + $0x18] sm:$0xff]  ;;  %v20_v5 = vld [vmem:[%s384_s0] sm:$0xff]  ;;  %v118_v8 = vld [vmem:[%s385_s3 + $0x8] sm:$0xff] }
   0x3   :  { %v277_v6 = vpack.c.bf16 %v25_v4, %v24_v2  ;;  %251 = vmatprep.mubr.msk.f32.mxu0 %vm33_vm0, %v20_v5  ;;  %v117_v7 = vld [vmem:[%s385_s3] sm:$0xff]  ;;  %v119_v9 = vld [vmem:[%s385_s3 + $0x10] sm:$0xff]  ;;  %v120_v11 = vld [vmem:[%s385_s3 + $0x18] sm:$0xff] }
   0x4   :  { %274 = vmatprep.subr.bf16.mxu0 %v273_v3  ;;  %v281_v10 = vpack.c.bf16 %v118_v8, %v117_v7  ;;  %v285_v12 = vpack.c.bf16 %v120_v11, %v119_v9  ;;  %v121_v13 = vld [vmem:[%s385_s3 + $0x20] sm:$0xff]  ;;  %v122_v14 = vld [vmem:[%s385_s3 + $0x28] sm:$0xff]  ;;  %v123_v17 = vld [vmem:[%s385_s3 + $0x30] sm:$0xff] }
   0x5   :  { %276 = vmatpush3.bf16.msra.mxu0 %v273_v3  ;;  %v289_v15 = vpack.c.bf16 %v122_v14, %v121_v13  ;;  %v21_v16 = vld [vmem:[%s384_s0 + $0x8] sm:$0xff]  ;;  %v124_v18 = vld [vmem:[%s385_s3 + $0x38] sm:$0xff]  ;;  %v221_v20 = vld [vmem:[%s386_s2] ss:$0 sm:$0xff] }
   0x6   :  { %278 = vmatprep.subr.bf16.mxu0 %v277_v6  ;;  %282 = vmatprep.subr.bf16.mxu1 %v281_v10  ;;  %v293_v19 = vpack.c.bf16 %v124_v18, %v123_v17  ;;  %v224_v27 = vld [vmem:[%s387_s4] ss:$0 sm:$0xff] }
   0x7   :  { %284 = vmatpush3.bf16.msra.mxu1 %v281_v10 }
   0x8   :  { %286 = vmatprep.subr.bf16.mxu1 %v285_v12 }
   0x9   :  { %280 = vmatpush3.bf16.msra.mxu0 %v277_v6 }
   0xb   :  { %288 = vmatpush3.bf16.msra.mxu1 %v285_v12 }
   0xc   :  { %252 = vmatmul.mubr.msk.f32.vlgmr.msra.gmra.mrb[0].mxu0 %vm33_vm0, %v21_v16  ;;  %290 = vmatprep.subr.bf16.mxu1 %v289_v15 }
   0xf   :  { %292 = vmatpush3.bf16.msra.mxu1 %v289_v15 }
  0x10   :  { %294 = vmatprep.subr.bf16.mxu1 %v293_v19 }
  0x13   :  { %296 = vmatpush3.bf16.msra.mxu1 %v293_v19 }
  0xdf   :  { %v253_v21 = vpop.f32.mrb[0].mxu0 }
  0xe0   :  { %v112_v22 = vadd.f32 %v253_v21, %v221_v20  ;;  %v106_v23 = vpop.f32.mrb[1].mxu0 }
  0xe1   :  { %v107_v24 = vadd.f32 %v221_v20, %v106_v23 }
  0xe2   :  { %v116_v26 = vmax.f32 %v112_v22, 0.0 }
  0xe3   :  { %v115_v25 = vmax.f32 %v107_v24, 0.0 }
  0xe5   :  { %270 = vmatprep.mubr.msk.f32.mxu1 %vm132_vm1, %v115_v25 }
  0xe6   :  { %271 = vmatmul.mubr.msk.f32.vlgmr.msra.gmra.mrb[0].mxu1 %vm132_vm1, %v116_v26 }
 0x1b9   :  { %v272_v28 = vpop.f32.mrb[0].mxu1 }
 0x1ba   :  { %v211_v29 = vadd.f32 %v272_v28, %v224_v27  ;;  %v205_v30 = vpop.f32.mrb[1].mxu1 }
 0x1bb   :  { %v206_v31 = vadd.f32 %v224_v27, %v205_v30 }
 0x1bc   :  { %216 = vst.msk [vmem:[%s388_s5 + $0x8] sm:$0xff] %vm214_vm2, %v211_v29 }
 0x1bd   :  { %215 = vst.msk [vmem:[%s388_s5] sm:$0xff] %vm214_vm2, %v206_v31 }

</bundles_post_ra>
